<compile_context>
chip_gen: v7x
topology: tpu7x:2x2x1
jax: 0.10.0
libtpu: 0.0.40
codegen_flags: <defaults>
</compile_context>

<pallas_src>
import jax
import jax.numpy as jnp
from jax.experimental import pallas as pl
from jax.experimental.pallas import tpu as pltpu


def _round_up(x, m):
    return ((x + m - 1) // m) * m


def _cdiv(a, b):
    return -(-a // b)


def _block_kernel(x_ref, w1_ref, b1_ref, w2_ref, b2_ref,
                  w3_ref, b3_ref, w4_ref, b4_ref, o_ref):
    # x_ref : (nb, c_in, t)    channel-plane slabs straight out of NCHW (compute dtype)
    # w_i   : (c_out, c_in)    Conv2d 1x1 weight, trailing 1x1 squeezed (compute dtype)
    # b_i   : (c_out, 1)       f32, added on the f32 MXU accumulator
    # o_ref : (nb, hidden, t)
    w1 = w1_ref[...]; w2 = w2_ref[...]; w3 = w3_ref[...]; w4 = w4_ref[...]
    b1 = b1_ref[...]; b2 = b2_ref[...]; b3 = b3_ref[...]; b4 = b4_ref[...]
    nb = x_ref.shape[0]
    for b in range(nb):  # static unroll; nb is small (<= 8)
        h = jnp.dot(w1, x_ref[b], preferred_element_type=jnp.float32)
        h = jnp.maximum(h + b1, 0.0)
        h = jnp.dot(w2, h.astype(w2.dtype), preferred_element_type=jnp.float32)
        h = jnp.maximum(h + b2, 0.0)
        h = jnp.dot(w3, h.astype(w3.dtype), preferred_element_type=jnp.float32)
        h = jnp.maximum(h + b3, 0.0)
        h = jnp.dot(w4, h.astype(w4.dtype), preferred_element_type=jnp.float32)
        h = jnp.maximum(h + b4, 0.0)
        o_ref[b] = h.astype(o_ref.dtype)


def _choose_tiling(n, c_in, hidden, hw, dsz, pixel_budget, max_nb):
    """Pick (nb images/step, pixel tile t, padded pixel count, #pixel tiles)."""
    # Shrink the per-step pixel budget so double-buffered in/out blocks plus f32
    # intermediates stay ~<=12 MiB (fits v5e's 16 MiB default scoped VMEM).
    per_pixel_bytes = hidden * (2 * dsz + 8) + c_in * 2 * dsz
    budget = max(256, min(pixel_budget, (12 * 1024 * 1024) // per_pixel_bytes))

    hw256 = _round_up(hw, 256)        # pixel axis padded once, to a lane multiple
    m = hw256 // 256                  # pixel extent in units of 256 lanes
    budget_m = max(1, budget // 256)

    if m >= budget_m:
        # Large images: one image per step, tile the pixel axis (ragged-tail friendly).
        nb = 1
        num_tiles = _cdiv(m, budget_m)
        if n * num_tiles < 2 and m >= 2:   # keep both v7x TensorCores busy
            num_tiles = max(num_tiles, 2)
        t = _cdiv(m, num_tiles) * 256
        hw_pad = t * num_tiles
    else:
        # Small images: whole image per step, batch several images per step.
        t = hw256
        hw_pad = hw256
        num_tiles = 1
        nb = max(1, min(max_nb, n, budget_m // m))
        while n % nb:                      # nb must divide n
            nb -= 1
        if (n // nb) < 2 and n >= 2:       # keep >= 2 grid programs when possible
            nb = max(1, n // 2)
            while n % nb:
                nb -= 1
    return nb, t, hw_pad, num_tiles


def block_forward(x_nchw, params, *, pixel_budget=8192, max_images_per_step=8,
                  compute_dtype=jnp.bfloat16):
    """x_nchw: (N, C_in, H, W).  Returns (N, hidden, H, W) in `compute_dtype`."""
    (w1, b1), (w2, b2), (w3, b3), (w4, b4) = params
    n, c_in, hh, ww = x_nchw.shape
    hidden = w1.shape[0]
    hw = hh * ww
    dsz = jnp.dtype(compute_dtype).itemsize

    nb, t, hw_pad, num_tiles = _choose_tiling(
        n, c_in, hidden, hw, dsz, pixel_budget, max_images_per_step)

    # Free view (no transpose): (N, C_in, H, W) -> (N, C_in, H*W); pad pixel tail only.
    x_rows = x_nchw.reshape(n, c_in, hw)
    if hw_pad != hw:
        x_rows = jnp.pad(x_rows, ((0, 0), (0, 0), (0, hw_pad - hw)))
    x_rows = x_rows.astype(compute_dtype)

    w1c, w2c, w3c, w4c = (w.astype(compute_dtype) for w in (w1, w2, w3, w4))
    # Biases stay f32: they are added on the f32 MXU accumulator.
    b1c, b2c, b3c, b4c = (b.reshape(hidden, 1).astype(jnp.float32)
                          for b in (b1, b2, b3, b4))

    # VMEM budget: double-buffered in/out blocks + (double-buffered) weights/biases
    # + f32 intermediate headroom.  Cap at v7x's 64 MiB physical VMEM.
    vmem_bytes = (
        2 * nb * c_in * t * dsz +
        2 * nb * hidden * t * dsz +
        2 * (hidden * c_in + 3 * hidden * hidden) * dsz +
        2 * 4 * _round_up(hidden, 8) * 128 * 4 +
        4 * hidden * t * 4)
    vmem_limit = int(min(64 * 1024 * 1024, max(32 * 1024 * 1024, 2 * vmem_bytes)))

    full = lambda b, p: (0, 0)  # weights / biases: one grid-invariant VMEM block

    out = pl.pallas_call(
        _block_kernel,
        out_shape=jax.ShapeDtypeStruct((n, hidden, hw_pad), compute_dtype),
        grid_spec=pltpu.PrefetchScalarGridSpec(
            num_scalar_prefetch=0,
            grid=(n // nb, num_tiles),
            in_specs=[
                pl.BlockSpec((nb, c_in, t), lambda b, p: (b, 0, p)),
                pl.BlockSpec((hidden, c_in), full),
                pl.BlockSpec((hidden, 1), full),
                pl.BlockSpec((hidden, hidden), full),
                pl.BlockSpec((hidden, 1), full),
                pl.BlockSpec((hidden, hidden), full),
                pl.BlockSpec((hidden, 1), full),
                pl.BlockSpec((hidden, hidden), full),
                pl.BlockSpec((hidden, 1), full),
            ],
            out_specs=pl.BlockSpec((nb, hidden, t), lambda b, p: (b, 0, p)),
        ),
        compiler_params=pltpu.CompilerParams(
            dimension_semantics=("parallel", "parallel"),
            vmem_limit_bytes=vmem_limit),
    )(x_rows, w1c, b1c, w2c, b2c, w3c, b3c, w4c, b4c)

    if hw_pad != hw:
        out = out[:, :, :hw]            # padded columns hold relu(bias) garbage; drop
    return out.reshape(n, hidden, hh, ww)   # free reshape, already NCHW order


def init_params(key, in_channels, hidden_channels):
    """Deterministic weights matching the Conv2d(1x1) shapes of fc1..fc4.

    Weights are stored as (c_out, c_in) (Conv2d weight with the 1x1 squeezed).
    """
    ks = jax.random.split(key, 8)
    def wb(kw, kb, cin, cout):
        bound = 1.0 / jnp.sqrt(cin)
        w = jax.random.uniform(kw, (cout, cin), jnp.float32, -bound, bound)
        b = jax.random.uniform(kb, (cout,), jnp.float32, -bound, bound)
        return w, b
    p1 = wb(ks[0], ks[1], in_channels, hidden_channels)
    p2 = wb(ks[2], ks[3], hidden_channels, hidden_channels)
    p3 = wb(ks[4], ks[5], hidden_channels, hidden_channels)
    p4 = wb(ks[6], ks[7], hidden_channels, hidden_channels)
    return (p1, p2, p3, p4)


def _reference(x_nchw, params, compute_dtype=jnp.float32):
    """Plain-JAX reference (1x1 conv == channel matmul).  When compute_dtype is bf16
    it emulates the kernel's mixed-precision path: bf16 operands, f32 accumulation,
    f32 bias + ReLU, bf16 activation between layers."""
    h = x_nchw.astype(compute_dtype)
    for (w, b) in params:  # w: (c_out, c_in)
        acc = jnp.einsum("nchw,dc->ndhw",
                         h.astype(jnp.float32),
                         w.astype(compute_dtype).astype(jnp.float32))
        h = jnp.maximum(acc + b[None, :, None, None].astype(jnp.float32), 0.0)
        h = h.astype(compute_dtype)
    return h


# NOTE: theta_b_fc / theta_f_fc and the backcast/forecast linspaces are built in
# __init__ but never used in Block.forward, so they are not in the kernel.
# TODO(synk): __batch_time_steps__ depends on torch_geometric's DataLoader and is not
# called by forward(); no Pallas equivalent implemented.

if __name__ == "__main__":
    key = jax.random.PRNGKey(0)
    k_x, k_p = jax.random.split(key)

    N, C_IN, HIDDEN, H, W = 2, 4, 32, 16, 16
    x = jax.random.normal(k_x, (N, C_IN, H, W), jnp.float32)
    params = init_params(k_p, C_IN, HIDDEN)

    # Exact f32 path.
    out_f32 = jax.block_until_ready(block_forward(x, params, compute_dtype=jnp.float32))
    ref_f32 = _reference(x, params, jnp.float32)
    assert out_f32.shape == (N, HIDDEN, H, W)
    assert jnp.allclose(out_f32, ref_f32, atol=1e-5, rtol=1e-5)

    # Default bf16-I/O path (f32 accumulation inside the kernel).
    out_bf16 = jax.block_until_ready(block_forward(x, params))
    ref_bf16 = _reference(x, params, jnp.bfloat16)
    assert out_bf16.shape == (N, HIDDEN, H, W)
    assert out_bf16.dtype == jnp.bfloat16
    assert jnp.allclose(out_bf16.astype(jnp.float32), ref_bf16.astype(jnp.float32),
                        atol=2e-2, rtol=2e-2)

    print("KERNEL_OK")
</pallas_src>

<mosaic_0001>
module attributes {stable_mosaic.version = 11 : i64} {
  func.func @_block_kernel(%arg0: i32, %arg1: i32, %arg2: memref<1x4x256xf32, #tpu.memory_space<vmem>>, %arg3: memref<32x4xf32, #tpu.memory_space<vmem>>, %arg4: memref<32x1xf32, #tpu.memory_space<vmem>>, %arg5: memref<32x32xf32, #tpu.memory_space<vmem>>, %arg6: memref<32x1xf32, #tpu.memory_space<vmem>>, %arg7: memref<32x32xf32, #tpu.memory_space<vmem>>, %arg8: memref<32x1xf32, #tpu.memory_space<vmem>>, %arg9: memref<32x32xf32, #tpu.memory_space<vmem>>, %arg10: memref<32x1xf32, #tpu.memory_space<vmem>>, %arg11: memref<1x32x256xf32, #tpu.memory_space<vmem>>) attributes {dimension_semantics = [#tpu.dimension_semantics<parallel>, #tpu.dimension_semantics<parallel>], iteration_bounds = array<i64: 2, 1>, scalar_prefetch = 0 : i64, scratch_operands = 0 : i64, tpu.core_type = #tpu.core_type<tc>, window_params = [{transform_indices = @transform_0, window_bounds = array<i64: 1, 4, 256>}, {pipeline_mode = #tpu.pipeline_mode<synchronous>, transform_indices = @transform_1, window_bounds = array<i64: 32, 4>}, {pipeline_mode = #tpu.pipeline_mode<synchronous>, transform_indices = @transform_2, window_bounds = array<i64: 32, 1>}, {pipeline_mode = #tpu.pipeline_mode<synchronous>, transform_indices = @transform_3, window_bounds = array<i64: 32, 32>}, {pipeline_mode = #tpu.pipeline_mode<synchronous>, transform_indices = @transform_4, window_bounds = array<i64: 32, 1>}, {pipeline_mode = #tpu.pipeline_mode<synchronous>, transform_indices = @transform_5, window_bounds = array<i64: 32, 32>}, {pipeline_mode = #tpu.pipeline_mode<synchronous>, transform_indices = @transform_6, window_bounds = array<i64: 32, 1>}, {pipeline_mode = #tpu.pipeline_mode<synchronous>, transform_indices = @transform_7, window_bounds = array<i64: 32, 32>}, {pipeline_mode = #tpu.pipeline_mode<synchronous>, transform_indices = @transform_8, window_bounds = array<i64: 32, 1>}, {transform_indices = @transform_9, window_bounds = array<i64: 1, 32, 256>}]} {
    %c0 = arith.constant 0 : index
    %c0_0 = arith.constant 0 : index
    %0 = vector.load %arg3[%c0, %c0_0] : memref<32x4xf32, #tpu.memory_space<vmem>>, vector<32x4xf32>
    %c0_1 = arith.constant 0 : index
    %c0_2 = arith.constant 0 : index
    %1 = vector.load %arg5[%c0_1, %c0_2] : memref<32x32xf32, #tpu.memory_space<vmem>>, vector<32x32xf32>
    %c0_3 = arith.constant 0 : index
    %c0_4 = arith.constant 0 : index
    %2 = vector.load %arg7[%c0_3, %c0_4] : memref<32x32xf32, #tpu.memory_space<vmem>>, vector<32x32xf32>
    %c0_5 = arith.constant 0 : index
    %c0_6 = arith.constant 0 : index
    %3 = vector.load %arg9[%c0_5, %c0_6] : memref<32x32xf32, #tpu.memory_space<vmem>>, vector<32x32xf32>
    %c0_7 = arith.constant 0 : index
    %c0_8 = arith.constant 0 : index
    %4 = vector.load %arg4[%c0_7, %c0_8] : memref<32x1xf32, #tpu.memory_space<vmem>>, vector<32x1xf32>
    %c0_9 = arith.constant 0 : index
    %c0_10 = arith.constant 0 : index
    %5 = vector.load %arg6[%c0_9, %c0_10] : memref<32x1xf32, #tpu.memory_space<vmem>>, vector<32x1xf32>
    %c0_11 = arith.constant 0 : index
    %c0_12 = arith.constant 0 : index
    %6 = vector.load %arg8[%c0_11, %c0_12] : memref<32x1xf32, #tpu.memory_space<vmem>>, vector<32x1xf32>
    %c0_13 = arith.constant 0 : index
    %c0_14 = arith.constant 0 : index
    %7 = vector.load %arg10[%c0_13, %c0_14] : memref<32x1xf32, #tpu.memory_space<vmem>>, vector<32x1xf32>
    %c0_15 = arith.constant 0 : index
    %c0_16 = arith.constant 0 : index
    %c0_17 = arith.constant 0 : index
    %8 = vector.load %arg2[%c0_15, %c0_16, %c0_17] : memref<1x4x256xf32, #tpu.memory_space<vmem>>, vector<1x4x256xf32>
    %9 = vector.shape_cast %8 : vector<1x4x256xf32> to vector<4x256xf32>
    %cst = arith.constant dense<0.000000e+00> : vector<32x256xf32>
    %10 = tpu.matmul %0, %9, %cst {dimension_numbers = #tpu.dot_dimension_numbers<[1], [0], [0], [1], [0, 0, 1, 1], [], []>} : vector<32x4xf32>, vector<4x256xf32>, vector<32x256xf32> -> vector<32x256xf32>
    %11 = vector.broadcast %4 : vector<32x1xf32> to vector<32x256xf32>
    %12 = arith.addf %10, %11 : vector<32x256xf32>
    %cst_18 = arith.constant 0.000000e+00 : f32
    %13 = vector.broadcast %cst_18 : f32 to vector<32x256xf32>
    %14 = arith.maximumf %12, %13 : vector<32x256xf32>
    %cst_19 = arith.constant dense<0.000000e+00> : vector<32x256xf32>
    %15 = tpu.matmul %1, %14, %cst_19 {dimension_numbers = #tpu.dot_dimension_numbers<[1], [0], [0], [1], [0, 0, 1, 1], [], []>} : vector<32x32xf32>, vector<32x256xf32>, vector<32x256xf32> -> vector<32x256xf32>
    %16 = vector.broadcast %5 : vector<32x1xf32> to vector<32x256xf32>
    %17 = arith.addf %15, %16 : vector<32x256xf32>
    %cst_20 = arith.constant 0.000000e+00 : f32
    %18 = vector.broadcast %cst_20 : f32 to vector<32x256xf32>
    %19 = arith.maximumf %17, %18 : vector<32x256xf32>
    %cst_21 = arith.constant dense<0.000000e+00> : vector<32x256xf32>
    %20 = tpu.matmul %2, %19, %cst_21 {dimension_numbers = #tpu.dot_dimension_numbers<[1], [0], [0], [1], [0, 0, 1, 1], [], []>} : vector<32x32xf32>, vector<32x256xf32>, vector<32x256xf32> -> vector<32x256xf32>
    %21 = vector.broadcast %6 : vector<32x1xf32> to vector<32x256xf32>
    %22 = arith.addf %20, %21 : vector<32x256xf32>
    %cst_22 = arith.constant 0.000000e+00 : f32
    %23 = vector.broadcast %cst_22 : f32 to vector<32x256xf32>
    %24 = arith.maximumf %22, %23 : vector<32x256xf32>
    %cst_23 = arith.constant dense<0.000000e+00> : vector<32x256xf32>
    %25 = tpu.matmul %3, %24, %cst_23 {dimension_numbers = #tpu.dot_dimension_numbers<[1], [0], [0], [1], [0, 0, 1, 1], [], []>} : vector<32x32xf32>, vector<32x256xf32>, vector<32x256xf32> -> vector<32x256xf32>
    %26 = vector.broadcast %7 : vector<32x1xf32> to vector<32x256xf32>
    %27 = arith.addf %25, %26 : vector<32x256xf32>
    %cst_24 = arith.constant 0.000000e+00 : f32
    %28 = vector.broadcast %cst_24 : f32 to vector<32x256xf32>
    %29 = arith.maximumf %27, %28 : vector<32x256xf32>
    %c0_25 = arith.constant 0 : index
    %c0_26 = arith.constant 0 : index
    %c0_27 = arith.constant 0 : index
    %30 = vector.load %arg11[%c0_25, %c0_26, %c0_27] : memref<1x32x256xf32, #tpu.memory_space<vmem>>, vector<1x32x256xf32>
    %31 = vector.shape_cast %30 : vector<1x32x256xf32> to vector<32x256xf32>
    %32 = vector.shape_cast %29 : vector<32x256xf32> to vector<1x32x256xf32>
    tpu.vector_store %arg11[%c0_25, %c0_26, %c0_27], %32 {strides = array<i32>} : memref<1x32x256xf32, #tpu.memory_space<vmem>>, vector<1x32x256xf32>,
    return
  }
  func.func @transform_0(%arg0: i32, %arg1: i32) -> (i32, i32, i32) {
    %c0_i32 = arith.constant 0 : i32
    %c0_i32_0 = arith.constant 0 : i32
    return %arg0, %c0_i32, %arg1 : i32, i32, i32
  }
  func.func @transform_1(%arg0: i32, %arg1: i32) -> (i32, i32) {
    %c0_i32 = arith.constant 0 : i32
    %c0_i32_0 = arith.constant 0 : i32
    %c0_i32_1 = arith.constant 0 : i32
    return %c0_i32, %c0_i32_0 : i32, i32
  }
  func.func @transform_2(%arg0: i32, %arg1: i32) -> (i32, i32) {
    %c0_i32 = arith.constant 0 : i32
    %c0_i32_0 = arith.constant 0 : i32
    %c0_i32_1 = arith.constant 0 : i32
    return %c0_i32, %c0_i32_0 : i32, i32
  }
  func.func @transform_3(%arg0: i32, %arg1: i32) -> (i32, i32) {
    %c0_i32 = arith.constant 0 : i32
    %c0_i32_0 = arith.constant 0 : i32
    %c0_i32_1 = arith.constant 0 : i32
    return %c0_i32, %c0_i32_0 : i32, i32
  }
  func.func @transform_4(%arg0: i32, %arg1: i32) -> (i32, i32) {
    %c0_i32 = arith.constant 0 : i32
    %c0_i32_0 = arith.constant 0 : i32
    %c0_i32_1 = arith.constant 0 : i32
    return %c0_i32, %c0_i32_0 : i32, i32
  }
  func.func @transform_5(%arg0: i32, %arg1: i32) -> (i32, i32) {
    %c0_i32 = arith.constant 0 : i32
    %c0_i32_0 = arith.constant 0 : i32
    %c0_i32_1 = arith.constant 0 : i32
    return %c0_i32, %c0_i32_0 : i32, i32
  }
  func.func @transform_6(%arg0: i32, %arg1: i32) -> (i32, i32) {
    %c0_i32 = arith.constant 0 : i32
    %c0_i32_0 = arith.constant 0 : i32
    %c0_i32_1 = arith.constant 0 : i32
    return %c0_i32, %c0_i32_0 : i32, i32
  }
  func.func @transform_7(%arg0: i32, %arg1: i32) -> (i32, i32) {
    %c0_i32 = arith.constant 0 : i32
    %c0_i32_0 = arith.constant 0 : i32
    %c0_i32_1 = arith.constant 0 : i32
    return %c0_i32, %c0_i32_0 : i32, i32
  }
  func.func @transform_8(%arg0: i32, %arg1: i32) -> (i32, i32) {
    %c0_i32 = arith.constant 0 : i32
    %c0_i32_0 = arith.constant 0 : i32
    %c0_i32_1 = arith.constant 0 : i32
    return %c0_i32, %c0_i32_0 : i32, i32
  }
  func.func @transform_9(%arg0: i32, %arg1: i32) -> (i32, i32, i32) {
    %c0_i32 = arith.constant 0 : i32
    %c0_i32_0 = arith.constant 0 : i32
    return %arg0, %c0_i32, %arg1 : i32, i32, i32
  }
}

</mosaic_0001>

<bundles_post_ra>
// kernel: tpu_custom_call.1
= control target key start
LH: loop header
LB: loop body
LE: loop exit
PB: predicated region body
PF: predicated region fallthrough
CT: control target
= control target key end

     0   :  { %14 = vsyncpa [#allocation3], 0  ;;  %s1535_s0 = inlined_call_operand.vmem [shape: f32[2,4,256], index: 0, kind: input, shape index: {}]   ;;  %s1536_s1 = inlined_call_operand.vmem [shape: f32[32,4], index: 1, kind: input, shape index: {}]   ;;  %s1537_s2 = inlined_call_operand.vmem [shape: f32[32,1], index: 2, kind: input, shape index: {}]   ;;  %s1538_s3 = inlined_call_operand.vmem [shape: f32[32,32], index: 3, kind: input, shape index: {}]   ;;  %s1539_s4 = inlined_call_operand.vmem [shape: f32[32,1], index: 4, kind: input, shape index: {}]   ;;  %s1540_s5 = inlined_call_operand.vmem [shape: f32[32,32], index: 5, kind: input, shape index: {}]   ;;  %s1541_s6 = inlined_call_operand.vmem [shape: f32[32,1], index: 6, kind: input, shape index: {}]   ;;  %s1542_s7 = inlined_call_operand.vmem [shape: f32[32,32], index: 7, kind: input, shape index: {}]   ;;  %s1543_s8 = inlined_call_operand.vmem [shape: f32[32,1], index: 8, kind: input, shape index: {}]   ;;  %s1544_s9 = inlined_call_operand.hbm [shape: f32[2,32,256], index: 9, kind: output, shape index: {}]  }
   0x1   :  { %16 = vsyncpa [#allocation3 + $0x1], 0  ;;  %s1277_s30 = smov 0   ;;  %s1279_s10 = smov 0  }
   0x2   :  { %s1281_s11 = smov 0   ;;  %s1283_s12 = smov 0  }
   0x3   :  { %s1285_s13 = smov 0   ;;  %s1287_s14 = smov 0  }
   0x4 LB: > { %s1023_s15 = sadd.s32 4294967295, %s1220_s14   ;;  %s1024_s16 = sadd.s32 4294967294, %s1220_s14   ;;  %s1220_s14 = sphi %s1287_s14, %s22_s14   ;;  %s1216_s13 = sphi %s1285_s13, %s1551_s13   ;;  %s1212_s12 = sphi %s1283_s12, %s1550_s12   ;;  %s1208_s11 = sphi %s1281_s11, %s1549_s11   ;;  %s1204_s10 = sphi %s1279_s10, %s1548_s10   ;;  %s1200_s30 = sphi %s1277_s30, %s1547_s30  }
   0x5   : > { %s34_s17 = sadd.s32 1, %s1216_s13  ;;  %s239_s18 = sadd.s32 1, %s1208_s11 }
   0x6   : > { %p36_p0 = scmp.ge.s32.totalorder %s34_s17, 2  ;;  %p249_p1 = scmp.ne.s32.totalorder %s1208_s11, %s1204_s10 }
   0x7   : > { %p250_p2 = scmp.eq.s32.totalorder %s1023_s15, 1  ;;  %p255_p3 = scmp.ne.s32.totalorder %s1204_s10, %s1200_s30 }
   0x8   : > { %s1553_s17 = smov (%p36_p0, %s34_s17), 0  ;;  %p256_p5 = scmp.eq.s32.totalorder %s1024_s16, 1 }
   0x9   : > { %p1317_p4 = por %p250_p2, %p249_p1  ;;  %s234_s20 = ssub.s32 %s1216_s13, %s1553_s17 }
   0xa   : > { %p1027_p6 = scmp.ge.s32.totalorder %s1220_s14, 1  ;;  %p237_p7 = scmp.eq.s32.totalorder %s234_s20, 0 }
   0xb   : > { %p1324_p8 = por %p256_p5, %p255_p3  ;;  %p311_p9 = scmp.lt.s32.totalorder %s1220_s14, 3 }
   0xc   : > { %s1330_s22 = scalar_select %p237_p7, %s1208_s11, %s239_s18  }
   0xd   : > { %p312_p10 = pnand %p1027_p6, %p311_p9 }
   0xe   : > { %p352_p11 = scmp.lt.s32.totalorder (!%p312_p10), %s1212_s12, 1  ;;  %v1222_v0 = vmov (!%p312_p10), 0.0   ;;  %v378_v1 = vld [vmem:[%s1537_s2] sm:$0xff] (!%p312_p10)  ;;  %v1223_v2 = vmov (!%p312_p10), 0   ;;  %v380_v3 = vld [vmem:[%s1537_s2 + $0x10] sm:$0xff] (!%p312_p10)  ;;  %v379_v4 = vld [vmem:[%s1537_s2 + $0x8] sm:$0xff] (!%p312_p10) }
   0xf   : > { %315 = sbr.rel (%p312_p10) target bundleno = 980 (0x3d4), region = 56  ;;  %499 = vmatprep.mubr.f32.mxu0 (!%p312_p10), %v1222_v0  ;;  %629 = vmatprep.mubr.f32.mxu1 (!%p312_p10), %v1222_v0  ;;  %v381_v5 = vld [vmem:[%s1537_s2 + $0x18] sm:$0xff] (!%p312_p10)  ;;  %vm430_vm0 = vcmask (!%p312_p10), 1043456   ;;  %v362_v8 = vld [vmem:[%s1536_s1] sm:$0xff] (!%p312_p10)  ;;  %vm417_vm1 = vcmask (!%p312_p10), 31744   ;;  %v383_v10 = vld [vmem:[%s1539_s4 + $0x8] sm:$0xff] (!%p312_p10) }
  0x10   : > { %1139 = vset.pattern.permute.xlu0 (!%p312_p10), %v1223_v2  ;;  %1140 = vset.pattern.permute.xlu1 (!%p312_p10), %v1223_v2  ;;  %v382_v9 = vld [vmem:[%s1539_s4] sm:$0xff] (!%p312_p10)  ;;  %v363_v11 = vld [vmem:[%s1536_s1 + $0x8] sm:$0xff] (!%p312_p10)  ;;  %v384_v12 = vld [vmem:[%s1539_s4 + $0x10] sm:$0xff] (!%p312_p10)  ;;  %vm552_vm2 = vcmask (!%p312_p10), 261120   ;;  %s348_s27 = sand.u32 (!%p312_p10), 1, %s1204_s10   ;;  %s1055_s15 = sshll.u32 (!%p312_p10), %s1212_s12, 10 }
  0x11   : > { %397 = vperm.xlu0 (!%p312_p10), %1139, %v378_v1   ;;  %407 = vperm.xlu1 (!%p312_p10), %1140, %v380_v3   ;;  %v385_v13 = vld [vmem:[%s1539_s4 + $0x18] sm:$0xff] (!%p312_p10)  ;;  %v364_v14 = vld [vmem:[%s1536_s1 + $0x10] sm:$0xff] (!%p312_p10)  ;;  %v386_v15 = vld [vmem:[%s1541_s6] sm:$0xff] (!%p312_p10)  ;;  %s1481_s20 = scalar_lea.hbm (!%p312_p10), %s1544_s9, %s1055_s15 }
  0x12   : > { %v387_v16 = vld [vmem:[%s1541_s6 + $0x8] sm:$0xff] (!%p312_p10)  ;;  %v365_v17 = vld [vmem:[%s1536_s1 + $0x18] sm:$0xff] (!%p312_p10)  ;;  %v388_v18 = vld [vmem:[%s1541_s6 + $0x10] sm:$0xff] (!%p312_p10) }
  0x13   : > { %v389_v19 = vld [vmem:[%s1541_s6 + $0x18] sm:$0xff] (!%p312_p10)  ;;  %v390_v20 = vld [vmem:[%s1543_s8] sm:$0xff] (!%p312_p10)  ;;  %v391_v21 = vld [vmem:[%s1543_s8 + $0x8] sm:$0xff] (!%p312_p10) }
  0x14   : > { %v392_v22 = vld [vmem:[%s1543_s8 + $0x10] sm:$0xff] (!%p312_p10)  ;;  %v393_v23 = vld [vmem:[%s1543_s8 + $0x18] sm:$0xff] (!%p312_p10)  ;;  %v366_v56 = vld [vmem:[%s1538_s3] sm:$0xff] (!%p312_p10) }
  0x15   : > { %402 = vperm.xlu0 (!%p312_p10), %1139, %v379_v4   ;;  %412 = vperm.xlu1 (!%p312_p10), %1140, %v381_v5   ;;  %v367_v57 = vld [vmem:[%s1538_s3 + $0x8] sm:$0xff] (!%p312_p10)  ;;  %v368_v58 = vld [vmem:[%s1538_s3 + $0x10] sm:$0xff] (!%p312_p10)  ;;  %v369_v59 = vld [vmem:[%s1538_s3 + $0x18] sm:$0xff] (!%p312_p10) }
  0x16   : > { %s353_s25 = scalar_select %p352_p11, %s1212_s12, 1 }
  0x17   : > { %s1489_s12 = scalar_lea.sflag [#allocation3], %s348_s27 }
  0x18   : > { %s1054_s28 = sshll.u32 %s353_s25, 3  ;;  %s1028_s25 = sshll.u32 %s348_s27, 6 }
  0x19   : > { %s359_s24 = scalar_lea.vmem %s1535_s0, %s1054_s28  ;;  %534 = vperm.xlu0 %1139, %v382_v9   ;;  %539 = vperm.xlu1 %1140, %v383_v10   ;;  %s1468_s29 = scalar_lea.vmem [#allocation2], %s1028_s25 }
  0x1a   : > { %v394_v6 = vld [vmem:[%s359_s24] sm:$0xff]  ;;  %s944_s16 = sshll.u32 %s1468_s29, 4  ;;  %s1224_s24 = smov [#allocation2]   ;;  %s1483_s16 = int_to_ptr.vmem [resolvable:$true] %s944_s16 }
  0x1b   : > { %v416_v7 = vcombine.high %v394_v6, %v394_v6  ;;  %s1142_s23 = scalar_lea.vmem %s1483_s16, 1024  ;;  %s1146_s26 = sshll.u32 %s1224_s24, 4  ;;  %s1147_s26 = int_to_ptr.vmem [resolvable:$false] %s1146_s26 }
  0x1c   : > { %p1143_p12 = scmp.ne.s32.totalorder %s1483_s16, %s1142_s23  ;;  %s1148_s25 = scalar_lea.vmem %s1147_s26, 2048 }
  0x1d   : > { %1031 = vmatprep.subr.msk.mxu0 %vm430_vm0, %v416_v7  ;;  %544 = vperm.xlu0 %1139, %v384_v12   ;;  %p1149_p1 = scmp.lt.s32.totalorder %s1483_s16, %s1147_s26  ;;  %p1150_p2 = scmp.lt.s32.totalorder %s1148_s25, %s1142_s23 }
  0x1e   : > { %1032 = vmatpush1.msk.msra.mxu0 %vm430_vm0, %v394_v6  ;;  %549 = vperm.xlu1 %1140, %v385_v13   ;;  %p1144_p13 = pnand %p1143_p12, %p1317_p4 }
  0x1f   : > { %1033 = vmatmul.mubr.msk.f32.vlgmr.msra.gmra.mrb[0].mxu0 %vm417_vm1, %v362_v8  ;;  %p1151_p3 = por %p1150_p2, %p1149_p1 }
  0x20   : > { %505 = vmatprep.mubr.f32.mxu0 %v1222_v0  ;;  %p1145_p0 = pneg %p1144_p13 }
  0x21   : > { %664 = vperm.xlu0 %1139, %v386_v15  }
  0x22   : > { %669 = vperm.xlu1 %1140, %v387_v16   ;;  %p1152_p5 = pnand %p1151_p3, %p1145_p0 }
  0x23   : > { %1034 = vmatmul.mubr.msk.f32.gmra.mrb[2].mxu0 %vm417_vm1, %v363_v11 }
  0x24   : > { %511 = vmatprep.mubr.f32.mxu0 %v1222_v0 }
  0x25   : > { %674 = vperm.xlu0 %1139, %v388_v18  }
  0x26   : > { %679 = vperm.xlu1 %1140, %v389_v19  }
  0x27   : > { %1035 = vmatmul.mubr.msk.f32.gmra.mrb[4].mxu0 %vm417_vm1, %v364_v14 }
  0x28   : > { %517 = vmatprep.mubr.f32.mxu0 %v1222_v0 }
  0x29   : > { %793 = vperm.xlu0 %1139, %v390_v20  }
  0x2a   : > { %798 = vperm.xlu1 %1140, %v391_v21  }
  0x2b   : > { %1036 = vmatmul.mubr.msk.f32.gmra.mrb[6].mxu0 %vm417_vm1, %v365_v17 }
  0x2c   : > { %758 = vmatprep.mubr.f32.mxu0 %v1222_v0 }
  0x2d   : > { %803 = vperm.xlu0 %1139, %v392_v22  }
  0x2e   : > { %808 = vperm.xlu1 %1140, %v393_v23  }
  0x90   : > { %v398_v24 = vpop.permute.xlu0 %397  ;;  %v408_v33 = vpop.permute.xlu1 %407 }
  0x94   : > { %v403_v28 = vpop.permute.xlu0 %402  ;;  %v413_v44 = vpop.permute.xlu1 %412 }
  0x98   : > { %v535_v62 = vpop.permute.xlu0 %534  ;;  %v540_v1 = vpop.permute.xlu1 %539 }
  0x9c   : > { %v545_v14 = vpop.permute.xlu0 %544 }
  0x9d   : > { %v550_v17 = vpop.permute.xlu1 %549 }
  0xf2   : > { %v501_v25 = vpop.f32.mrb[0].mxu0 }
  0xf3   : > { %v503_v26 = vpop.f32.mrb[1].mxu0  ;;  %v502_v27 = vadd.f32 %v501_v25, %v398_v24 }
  0xf4   : > { %v504_v29 = vadd.f32 %v503_v26, %v398_v24 }
  0xf5   : > { %v524_v35 = vmax.f32 %v502_v27, 0.0 }
  0xf6   : > { %v507_v30 = vpop.f32.mrb[2].mxu0  ;;  %v525_v37 = vmax.f32 %v504_v29, 0.0  ;;  %v370_v29 = vld [vmem:[%s1540_s5] sm:$0xff] }
  0xf7   : > { %v508_v31 = vadd.f32 %v507_v30, %v403_v28  ;;  %v509_v32 = vpop.f32.mrb[3].mxu0  ;;  %v371_v30 = vld [vmem:[%s1540_s5 + $0x8] sm:$0xff] }
  0xf8   : > { %v510_v34 = vadd.f32 %v509_v32, %v403_v28  ;;  %v373_v32 = vld [vmem:[%s1540_s5 + $0x18] sm:$0xff] }
  0xf9   : > { %v526_v36 = vmax.f32 %v508_v31, 0.0  ;;  %v372_v31 = vld [vmem:[%s1540_s5 + $0x10] sm:$0xff] }
  0xfa   : > { %v527_v38 = vmax.f32 %v510_v34, 0.0  ;;  %v513_v39 = vpop.f32.mrb[4].mxu0 }
  0xfb   : > { %v515_v40 = vpop.f32.mrb[5].mxu0  ;;  %v1058_v41 = vpack.c.bf16 %v526_v36, %v524_v35  ;;  %v514_v43 = vadd.f32 %v513_v39, %v408_v33  ;;  %v665_v35 = vpop.permute.xlu0 %664 }
  0xfc   : > { %v1056_v42 = vpack.c.bf16 %v527_v38, %v525_v37  ;;  %v516_v45 = vadd.f32 %v515_v40, %v408_v33  ;;  %v670_v37 = vpop.permute.xlu1 %669 }
  0xfd   : > { %v528_v50 = vmax.f32 %v514_v43, 0.0 }
  0xfe   : > { %v519_v46 = vpop.f32.mrb[6].mxu0  ;;  %1057 = vmatprep.subr.bf16.mxu1 %v1056_v42  ;;  %v529_v52 = vmax.f32 %v516_v45, 0.0 }
  0xff   : > { %v520_v47 = vadd.f32 %v519_v46, %v413_v44  ;;  %v521_v48 = vpop.f32.mrb[7].mxu0  ;;  %1059 = vmatpush1.bf16.msra.mxu1 %v1058_v41 }
 0x100   : > { %v522_v49 = vadd.f32 %v521_v48, %v413_v44 }
 0x101   : > { %v530_v51 = vmax.f32 %v520_v47, 0.0 }
 0x102   : > { %v531_v53 = vmax.f32 %v522_v49, 0.0 }
 0x103   : > { %v1062_v54 = vpack.c.bf16 %v530_v51, %v528_v50  ;;  %v675_v50 = vpop.permute.xlu0 %674 }
 0x104   : > { %v1060_v55 = vpack.c.bf16 %v531_v53, %v529_v52  ;;  %v680_v53 = vpop.permute.xlu1 %679 }
 0x106   : > { %1061 = vmatprep.subr.bf16.mxu1 %v1060_v55 }
 0x107   : > { %1063 = vmatpush1.bf16.msra.mxu1 %v1062_v54 }
 0x10a   : > { %1037 = vmatmul.mubr.msk.f32.vlgmr.msra.gmra.mrb[0].mxu1 %vm552_vm2, %v366_v56 }
 0x10b   : > { %635 = vmatprep.mubr.f32.mxu1 %v1222_v0 }
 0x10e   : > { %1038 = vmatmul.mubr.msk.f32.gmra.mrb[2].mxu1 %vm552_vm2, %v367_v57 }
 0x10f   : > { %641 = vmatprep.mubr.f32.mxu1 %v1222_v0 }
 0x112   : > { %1039 = vmatmul.mubr.msk.f32.gmra.mrb[4].mxu1 %vm552_vm2, %v368_v58 }
 0x113   : > { %647 = vmatprep.mubr.f32.mxu1 %v1222_v0 }
 0x116   : > { %1040 = vmatmul.mubr.msk.f32.gmra.mrb[6].mxu1 %vm552_vm2, %v369_v59 }
 0x117   : > { %887 = vmatprep.mubr.f32.mxu1 %v1222_v0 }
 0x1dd   : > { %v631_v60 = vpop.f32.mrb[0].mxu1 }
 0x1de   : > { %v633_v61 = vpop.f32.mrb[1].mxu1  ;;  %v632_v63 = vadd.f32 %v631_v60, %v535_v62 }
 0x1df   : > { %v634_v2 = vadd.f32 %v633_v61, %v535_v62 }
 0x1e0   : > { %v654_v7 = vmax.f32 %v632_v63, 0.0 }
 0x1e1   : > { %v637_v3 = vpop.f32.mrb[2].mxu1  ;;  %v655_v9 = vmax.f32 %v634_v2, 0.0  ;;  %v374_v2 = vld [vmem:[%s1542_s7] sm:$0xff] }
 0x1e2   : > { %v638_v4 = vadd.f32 %v637_v3, %v540_v1  ;;  %v639_v5 = vpop.f32.mrb[3].mxu1  ;;  %v375_v3 = vld [vmem:[%s1542_s7 + $0x8] sm:$0xff] }
 0x1e3   : > { %v640_v6 = vadd.f32 %v639_v5, %v540_v1  ;;  %v377_v5 = vld [vmem:[%s1542_s7 + $0x18] sm:$0xff] }
 0x1e4   : > { %v656_v8 = vmax.f32 %v638_v4, 0.0  ;;  %v376_v4 = vld [vmem:[%s1542_s7 + $0x10] sm:$0xff] }
 0x1e5   : > { %v657_v10 = vmax.f32 %v640_v6, 0.0  ;;  %v643_v11 = vpop.f32.mrb[4].mxu1  ;;  %v794_v6 = vpop.permute.xlu0 %793 }
 0x1e6   : > { %v1066_v12 = vpack.c.bf16 %v656_v8, %v654_v7  ;;  %v645_v13 = vpop.f32.mrb[5].mxu1  ;;  %v644_v16 = vadd.f32 %v643_v11, %v545_v14 }
 0x1e7   : > { %v1064_v15 = vpack.c.bf16 %v657_v10, %v655_v9  ;;  %v646_v18 = vadd.f32 %v645_v13, %v545_v14 }
 0x1e8   : > { %v658_v23 = vmax.f32 %v644_v16, 0.0 }
 0x1e9   : > { %v649_v19 = vpop.f32.mrb[6].mxu1  ;;  %1065 = vmatprep.subr.bf16.mxu0 %v1064_v15  ;;  %v659_v25 = vmax.f32 %v646_v18, 0.0  ;;  %v804_v18 = vpop.permute.xlu0 %803 }
 0x1ea   : > { %v650_v20 = vadd.f32 %v649_v19, %v550_v17  ;;  %v651_v21 = vpop.f32.mrb[7].mxu1  ;;  %1067 = vmatpush1.bf16.msra.mxu0 %v1066_v12  ;;  %v799_v12 = vpop.permute.xlu1 %798 }
 0x1eb   : > { %v652_v22 = vadd.f32 %v651_v21, %v550_v17 }
 0x1ec   : > { %v660_v24 = vmax.f32 %v650_v20, 0.0 }
 0x1ed   : > { %v661_v26 = vmax.f32 %v652_v22, 0.0 }
 0x1ee   : > { %v1070_v27 = vpack.c.bf16 %v660_v24, %v658_v23 }
 0x1ef   : > { %v1068_v28 = vpack.c.bf16 %v661_v26, %v659_v25  ;;  %v809_v25 = vpop.permute.xlu1 %808 }
 0x1f1   : > { %1069 = vmatprep.subr.bf16.mxu0 %v1068_v28 }
 0x1f2   : > { %1071 = vmatpush1.bf16.msra.mxu0 %v1070_v27 }
 0x1f5   : > { %1041 = vmatmul.mubr.msk.f32.vlgmr.msra.gmra.mrb[8].mxu0 %vm552_vm2, %v370_v29 }
 0x1f6   : > { %764 = vmatprep.mubr.f32.mxu0 %v1222_v0 }
 0x1f9   : > { %1042 = vmatmul.mubr.msk.f32.gmra.mrb[10].mxu0 %vm552_vm2, %v371_v30 }
 0x1fa   : > { %770 = vmatprep.mubr.f32.mxu0 %v1222_v0 }
 0x1fd   : > { %1043 = vmatmul.mubr.msk.f32.gmra.mrb[12].mxu0 %vm552_vm2, %v372_v31 }
 0x1fe   : > { %776 = vmatprep.mubr.f32.mxu0 %v1222_v0 }
 0x201   : > { %1044 = vmatmul.mubr.msk.f32.gmra.mrb[14].mxu0 %vm552_vm2, %v373_v32 }
 0x2c8   : > { %v760_v33 = vpop.f32.mrb[8].mxu0 }
 0x2c9   : > { %v762_v34 = vpop.f32.mrb[9].mxu0  ;;  %v761_v36 = vadd.f32 %v760_v33, %v665_v35 }
 0x2ca   : > { %v763_v38 = vadd.f32 %v762_v34, %v665_v35 }
 0x2cb   : > { %v783_v43 = vmax.f32 %v761_v36, 0.0 }
 0x2cc   : > { %v766_v39 = vpop.f32.mrb[10].mxu0  ;;  %v784_v45 = vmax.f32 %v763_v38, 0.0 }
 0x2cd   : > { %v767_v40 = vadd.f32 %v766_v39, %v670_v37  ;;  %v768_v41 = vpop.f32.mrb[11].mxu0 }
 0x2ce   : > { %v769_v42 = vadd.f32 %v768_v41, %v670_v37 }
 0x2cf   : > { %v785_v44 = vmax.f32 %v767_v40, 0.0 }
 0x2d0   : > { %v786_v46 = vmax.f32 %v769_v42, 0.0  ;;  %v772_v47 = vpop.f32.mrb[12].mxu0 }
 0x2d1   : > { %v1074_v48 = vpack.c.bf16 %v785_v44, %v783_v43  ;;  %v774_v49 = vpop.f32.mrb[13].mxu0  ;;  %v773_v52 = vadd.f32 %v772_v47, %v675_v50 }
 0x2d2   : > { %v1072_v51 = vpack.c.bf16 %v786_v46, %v784_v45  ;;  %v775_v54 = vadd.f32 %v774_v49, %v675_v50 }
 0x2d3   : > { %v787_v59 = vmax.f32 %v773_v52, 0.0 }
 0x2d4   : > { %v778_v55 = vpop.f32.mrb[14].mxu0  ;;  %1073 = vmatprep.subr.bf16.mxu1 %v1072_v51  ;;  %v788_v61 = vmax.f32 %v775_v54, 0.0 }
 0x2d5   : > { %v779_v56 = vadd.f32 %v778_v55, %v680_v53  ;;  %v780_v57 = vpop.f32.mrb[15].mxu0  ;;  %1075 = vmatpush1.bf16.msra.mxu1 %v1074_v48 }
 0x2d6   : > { %v781_v58 = vadd.f32 %v780_v57, %v680_v53 }
 0x2d7   : > { %v789_v60 = vmax.f32 %v779_v56, 0.0 }
 0x2d8   : > { %v790_v62 = vmax.f32 %v781_v58, 0.0 }
 0x2d9   : > { %v1078_v63 = vpack.c.bf16 %v789_v60, %v787_v59 }
 0x2da   : > { %v1076_v1 = vpack.c.bf16 %v790_v62, %v788_v61 }
 0x2dc   : > { %1077 = vmatprep.subr.bf16.mxu1 %v1076_v1 }
 0x2dd   : > { %1079 = vmatpush1.bf16.msra.mxu1 %v1078_v63 }
 0x2e0   : > { %1045 = vmatmul.mubr.msk.f32.vlgmr.msra.gmra.mrb[8].mxu1 %vm552_vm2, %v374_v2 }
 0x2e1   : > { %893 = vmatprep.mubr.f32.mxu1 %v1222_v0 }
 0x2e4   : > { %1046 = vmatmul.mubr.msk.f32.gmra.mrb[10].mxu1 %vm552_vm2, %v375_v3 }
 0x2e5   : > { %899 = vmatprep.mubr.f32.mxu1 %v1222_v0 }
 0x2e8   : > { %1047 = vmatmul.mubr.msk.f32.gmra.mrb[12].mxu1 %vm552_vm2, %v376_v4 }
 0x2e9   : > { %905 = vmatprep.mubr.f32.mxu1 %v1222_v0 }
 0x2ec   : > { %1048 = vmatmul.mubr.msk.f32.gmra.mrb[14].mxu1 %vm552_vm2, %v377_v5 }
 0x3b3   : > { %v889_v7 = vpop.f32.mrb[8].mxu1 }
 0x3b4   : > { %v890_v8 = vadd.f32 %v889_v7, %v794_v6  ;;  %v891_v9 = vpop.f32.mrb[9].mxu1 }
 0x3b5   : > { %v892_v10 = vadd.f32 %v891_v9, %v794_v6 }
 0x3b6   : > { %v912_v11 = vmax.f32 %v890_v8, 0.0 }
 0x3b7   : > { %v913_v13 = vmax.f32 %v892_v10, 0.0  ;;  %v895_v14 = vpop.f32.mrb[10].mxu1 }
 0x3b8   : > { %920 = vst [vmem:[%s1468_s29] sm:$0xff] %v912_v11  ;;  %v896_v0 = vadd.f32 %v895_v14, %v799_v12  ;;  %v897_v15 = vpop.f32.mrb[11].mxu1 }
 0x3b9   : > { %921 = vst [vmem:[%s1468_s29 + $0x8] sm:$0xff] %v913_v13  ;;  %v898_v16 = vadd.f32 %v897_v15, %v799_v12 }
 0x3ba   : > { %v914_v17 = vmax.f32 %v896_v0, 0.0 }
 0x3bb   : > { %v915_v19 = vmax.f32 %v898_v16, 0.0  ;;  %v901_v20 = vpop.f32.mrb[12].mxu1 }
 0x3bc   : > { %922 = vst [vmem:[%s1468_s29 + $0x10] sm:$0xff] %v914_v17  ;;  %v902_v21 = vadd.f32 %v901_v20, %v804_v18  ;;  %v903_v22 = vpop.f32.mrb[13].mxu1 }
 0x3bd   : > { %923 = vst [vmem:[%s1468_s29 + $0x18] sm:$0xff] %v915_v19  ;;  %v904_v23 = vadd.f32 %v903_v22, %v804_v18 }
 0x3be   : > { %v916_v24 = vmax.f32 %v902_v21, 0.0 }
 0x3bf   : > { %v917_v26 = vmax.f32 %v904_v23, 0.0  ;;  %v907_v27 = vpop.f32.mrb[14].mxu1 }
 0x3c0   : > { %924 = vst [vmem:[%s1468_s29 + $0x20] sm:$0xff] %v916_v24  ;;  %v908_v28 = vadd.f32 %v907_v27, %v809_v25  ;;  %v909_v29 = vpop.f32.mrb[15].mxu1 }
 0x3c1   : > { %925 = vst [vmem:[%s1468_s29 + $0x28] sm:$0xff] %v917_v26  ;;  %v910_v30 = vadd.f32 %v909_v29, %v809_v25 }
 0x3c2   : > { %v918_v31 = vmax.f32 %v908_v28, 0.0 }
 0x3c3   : > { %v919_v32 = vmax.f32 %v910_v30, 0.0 }
 0x3c4   : > { %926 = vst [vmem:[%s1468_s29 + $0x30] sm:$0xff] %v918_v31 }
 0x3c5   : > { %927 = vst [vmem:[%s1468_s29 + $0x38] sm:$0xff] %v919_v32 }
 0x3c6   : > { %1155 = shalt.err (!%p1152_p5)
}
 0x3c7   : > { %s1156_s27 = scalar_lea.hbm %s1481_s20, 1024  ;;  %s1160_s28 = scalar_lea.hbm %s1544_s9, 2048 }
 0x3c8   : > { %p1157_p6 = scmp.ne.s32.totalorder %s1481_s20, %s1156_s27  ;;  %p1161_p10 = scmp.lt.u32.totalorder %s1481_s20, %s1544_s9 }
 0x3c9   : > { %p1162_p11 = scmp.lt.u32.totalorder %s1160_s28, %s1156_s27  ;;  %p1164_p13 = scmp.lt.u32.totalorder %s1156_s27, %s1481_s20 }
 0x3ca   : > { %p1158_p7 = pnand %p1157_p6, %p1317_p4 }
 0x3cb   : > { %p1163_p12 = por %p1162_p11, %p1161_p10 }
 0x3cc   : > { %p1159_p9 = pneg %p1158_p7 }
 0x3cd   : > { %p1165_p0 = por %p1164_p13, %p1163_p12 }
 0x3cf   : > { %p1166_p1 = pnand %p1165_p0, %p1159_p9 }
 0x3d1   : > { %1169 = shalt.err (!%p1166_p1)
}
 0x3d2   : > { %s1225_s23 = smov 256   ;;  %s1226_s26 = smov 16  }
 0x3d3   : > { %1080 = dma.vmem_to_hbm [thread:$0]  (%p1317_p4), %s1483_s16, 1024, %s1481_s20, %s1489_s12, %s1225_s23, %s1225_s23, %s1226_s26  }
 0x3d4 PF: > { %p1086_p2 = scmp.ge.s32.totalorder %s1220_s14, 2  ;;  %s959_s25 = sand.u32 1, %s1200_s30  }
 0x3d5   : > { %s960_s27 = scalar_lea.sflag [#allocation3], %s959_s25 }
 0x3d6   : > { %p1083_p3 = pnand %p1086_p2, %p1324_p8 }
 0x3d8   : > { %1195 = dma.done.wait (!%p1083_p3), %s960_s27, 1024  }
 0x3d9   : > { %1197 = vsyncadd (!%p1083_p3), %s960_s27, 4294966272  ;;  %s22_s14 = sadd.s32 1, %s1220_s14   ;;  %s1547_s30 = smov %s1204_s10 }
 0x3da   : > { %p19_p5 = scmp.ge.s32.totalorder %s22_s14, 4   ;;  %s1548_s10 = smov %s1208_s11 }
 0x3db   : > { %s1549_s11 = smov %s1330_s22  ;;  %s1550_s12 = smov %s1216_s13 }
 0x3dc   : > { %s1551_s13 = smov %s1553_s17  ;;  %21 = sbr.rel (!%p19_p5) target bundleno = 4 (0x4), region = 91 }
 0x3e3   :  { %965 = vsyncpa [#allocation3], 1 }
 0x3e4   :  { %967 = vsyncpa [#allocation3 + $0x1], 1 }

</bundles_post_ra>
